<compile_context>
chip_gen: v6e
topology: v6e:2x2x1
jax: 0.10.0
libtpu: 0.0.40
codegen_flags: <defaults>
</compile_context>

<pallas_src>
import jax
import jax.numpy as jnp
from jax import lax
from jax.experimental import pallas as pl
from jax.experimental.pallas import tpu as pltpu

_EPS = 1e-5
_NEG_SLOPE = 0.01                      # nn.LeakyReLU default negative_slope
_VMEM_LIMIT = 48 * 1024 * 1024         # scoped-VMEM budget (fits v7x's 64 MiB)
_L_TILE_CAP = 1024                     # lane tile for the elementwise BN pass


def _const_spec(block_shape, index_map):
    """BlockSpec for a grid-constant block; single-buffered when supported."""
    buffered = getattr(pl, "Buffered", None)
    if buffered is not None:
        try:
            return pl.BlockSpec(block_shape, index_map,
                                pipeline_mode=buffered(1))
        except TypeError:              # older jax: no pipeline_mode kwarg
            pass
    return pl.BlockSpec(block_shape, index_map)


# ---------------------------------------------------------------------------
# Pass 1: fused attention + expert mixing + dynamic conv (+ 1x1 residual conv)
#         + per-batch BatchNorm partial statistics.  grid = (bs,), "parallel".
# ---------------------------------------------------------------------------
def _make_conv_kernel(in_c, out_c, K, ks, pad, length, has_res, mm_dtype):
    inv_l = 1.0 / length               # compile-time constant (avg pool)
    roll_ok = (length % 128 == 0)      # pltpu.roll on a lane-aligned axis

    def kernel(x_ref, attw_ref, attb_ref, w_ref, biasT_ref, *rest):
        if has_res:
            (resw_ref, resb_ref,
             y_ref, csum_ref, csq_ref, yr_ref, rsum_ref, rsq_ref) = rest
        else:
            y_ref, csum_ref, csq_ref = rest

        f32 = jnp.float32
        x_b = x_ref[0].astype(f32)                                  # (in, L)

        # --- attention: avg-pool over L + 1x1 conv + exact softmax over K ---
        pooled = jnp.sum(x_b, axis=1, keepdims=True) * inv_l        # (in, 1)
        logits = jnp.dot(attw_ref[...], pooled,
                         preferred_element_type=f32) + attb_ref[...]  # (K, 1)
        logits = logits - jnp.max(logits, axis=0, keepdims=True)
        e = jnp.exp(logits)
        att = e / jnp.sum(e, axis=0, keepdims=True)                 # exact

        # --- expert mixing: K static scalar-broadcast FMAs, kept in the
        #     (out, ks*in) layout the shifted matmuls consume directly ---
        mw = None
        for j in range(K):
            term = att[j:j + 1, 0:1] * w_ref[j]                     # (out, ks*in)
            mw = term if mw is None else mw + term
        mbias = jnp.dot(biasT_ref[...], att,
                        preferred_element_type=f32)                 # (out, 1)

        # --- dynamic conv: ks shifted matmuls, no pad / im2col slabs ---
        col = lax.broadcasted_iota(jnp.int32, (1, length), 1)
        acc = None
        for k in range(ks):
            s = pad - k                                             # static shift
            if s == 0:
                xs = x_b
            elif roll_ok:
                # XLU rotate + boundary mask (wrapped lanes are the zero pad)
                xs = pltpu.roll(x_b, shift=s % length, axis=1)
                mask = (col >= s) & (col < length + s)
                xs = jnp.where(mask, xs, 0.0)
            elif s > 0:
                xs = jnp.concatenate(
                    [jnp.zeros((in_c, s), f32), x_b[:, :length - s]], axis=1)
            else:
                xs = jnp.concatenate(
                    [x_b[:, -s:], jnp.zeros((in_c, -s), f32)], axis=1)
            wk = mw[:, k * in_c:(k + 1) * in_c]                     # (out, in)
            part = jnp.dot(wk.astype(mm_dtype), xs.astype(mm_dtype),
                           preferred_element_type=f32)
            acc = part if acc is None else acc + part
        y = acc + mbias                                             # (out, L) f32

        y_ref[0] = y.astype(y_ref.dtype)
        # lane-dense per-batch BN partial stats (channels on the lane axis)
        csum_ref[0] = jnp.sum(y, axis=1, keepdims=True).reshape(1, out_c)
        csq_ref[0] = jnp.sum(y * y, axis=1, keepdims=True).reshape(1, out_c)

        if has_res:
            r = jnp.dot(resw_ref[...].astype(mm_dtype), x_b.astype(mm_dtype),
                        preferred_element_type=f32) + resb_ref[...]
            yr_ref[0] = r.astype(yr_ref.dtype)
            rsum_ref[0] = jnp.sum(r, axis=1, keepdims=True).reshape(1, out_c)
            rsq_ref[0] = jnp.sum(r * r, axis=1, keepdims=True).reshape(1, out_c)

    return kernel


# ---------------------------------------------------------------------------
# Pass 2: BN apply (precomputed scale/shift) + residual add + LeakyReLU.
# grid = (bs, cdiv(L, l_tile)), both "parallel", lane-dense NCL output.
# ---------------------------------------------------------------------------
def _make_bn_act_kernel(has_res):
    def kernel(*refs):
        f32 = jnp.float32
        if has_res:
            y_ref, yr_ref, sc_ref, sr_ref, sh_ref, out_ref = refs
            v = (y_ref[0].astype(f32) * sc_ref[...] +
                 yr_ref[0].astype(f32) * sr_ref[...] + sh_ref[...])
        else:
            y_ref, x_ref, sc_ref, sh_ref, out_ref = refs
            v = (y_ref[0].astype(f32) * sc_ref[...] + sh_ref[...] +
                 x_ref[0].astype(f32))
        out_ref[0] = jnp.where(v >= 0.0, v, _NEG_SLOPE * v).astype(out_ref.dtype)

    return kernel


def res_dyconv1d_block(x, params, *, kernel_size, stride=1, dilation=1,
                       matmul_dtype=jnp.float32,
                       intermediate_dtype=jnp.bfloat16):
    """Forward pass of Res_DYConv1d_block (training-mode BatchNorm).

    x: (bs, in_planes, L) NCL.  Returns (bs, out_planes, L), dtype of x.

    matmul_dtype: MXU operand dtype for the conv contractions.  bf16 is valid
      (and ~2x denser) on v5e / v6e / v7x; accumulation is always f32.
      (v7x's MXU has no integer path, so an int8-weight variant would only
      make sense on v5e/v6e; keep bf16/fp8 on v7x.)
    intermediate_dtype: dtype of the conv / residual activations handed from
      pass 1 to pass 2 through HBM (BN statistics stay f32).  bf16 halves the
      dominant HBM streams; use f32 for strict parity testing.
    """
    # TODO(synk): only the shape-preserving configuration (stride=1,
    # dilation=1, odd kernel_size) is supported; the PyTorch module's .view()
    # silently assumes it as well.
    assert stride == 1 and dilation == 1 and kernel_size % 2 == 1

    bs, in_c, length = x.shape
    K, out_c, in_c_w, ks = params["weight"].shape
    assert ks == kernel_size and in_c_w == in_c
    pad = (kernel_size - 1) // 2
    ksin = ks * in_c
    has_res = (in_c != out_c)
    f32 = jnp.float32

    # ---- small parameter re-layouts only (x is left untouched) ----
    # per-expert (out, ks, in) flattened tap-major so mw[:, k*in + c] is
    # tap k / channel c, matching the shifted-matmul order.
    w_mix = jnp.transpose(params["weight"], (0, 1, 3, 2)).reshape(
        K, out_c, ksin).astype(f32)                                 # (K, out, ks*in)
    bias_T = jnp.transpose(params["bias"]).astype(f32)              # (out, K)
    att_w = params["att_w"][:, :, 0].astype(f32)                    # (K, in)
    att_b = params["att_b"].reshape(K, 1).astype(f32)               # (K, 1)

    # ---------------- Pass 1: fused attention/mix + conv + stats ----------------
    conv_inputs = [x, att_w, att_b, w_mix, bias_T]
    conv_in_specs = [
        pl.BlockSpec((1, in_c, length), lambda b: (b, 0, 0)),
        _const_spec((K, in_c), lambda b: (0, 0)),
        _const_spec((K, 1), lambda b: (0, 0)),
        _const_spec((K, out_c, ksin), lambda b: (0, 0, 0)),
        _const_spec((out_c, K), lambda b: (0, 0)),
    ]
    conv_out_shapes = [
        jax.ShapeDtypeStruct((bs, out_c, length), intermediate_dtype),
        jax.ShapeDtypeStruct((bs, 1, out_c), f32),
        jax.ShapeDtypeStruct((bs, 1, out_c), f32),
    ]
    conv_out_specs = [
        pl.BlockSpec((1, out_c, length), lambda b: (b, 0, 0)),
        pl.BlockSpec((1, 1, out_c), lambda b: (b, 0, 0)),
        pl.BlockSpec((1, 1, out_c), lambda b: (b, 0, 0)),
    ]
    if has_res:
        res_w = params["res_w"][:, :, 0].astype(f32)                # (out, in)
        res_b = params["res_b"].reshape(out_c, 1).astype(f32)       # (out, 1)
        conv_inputs += [res_w, res_b]
        conv_in_specs += [
            _const_spec((out_c, in_c), lambda b: (0, 0)),
            _const_spec((out_c, 1), lambda b: (0, 0)),
        ]
        conv_out_shapes += [
            jax.ShapeDtypeStruct((bs, out_c, length), intermediate_dtype),
            jax.ShapeDtypeStruct((bs, 1, out_c), f32),
            jax.ShapeDtypeStruct((bs, 1, out_c), f32),
        ]
        conv_out_specs += [
            pl.BlockSpec((1, out_c, length), lambda b: (b, 0, 0)),
            pl.BlockSpec((1, 1, out_c), lambda b: (b, 0, 0)),
            pl.BlockSpec((1, 1, out_c), lambda b: (b, 0, 0)),
        ]

    # TODO(synk): pass 1 keeps one full (C, L) batch slab resident; for very
    # large C*L on v7x (64 MiB VMEM) it should additionally tile L with a
    # pad-wide halo via a manual double-buffered make_async_copy.
    conv_outs = pl.pallas_call(
        _make_conv_kernel(in_c, out_c, K, ks, pad, length, has_res,
                          matmul_dtype),
        grid=(bs,),
        in_specs=conv_in_specs,
        out_specs=conv_out_specs,
        out_shape=conv_out_shapes,
        compiler_params=pltpu.CompilerParams(
            dimension_semantics=("parallel",), vmem_limit_bytes=_VMEM_LIMIT),
    )(*conv_inputs)

    if has_res:
        y_conv, c_sum, c_sq, y_res, r_sum, r_sq = conv_outs
    else:
        y_conv, c_sum, c_sq = conv_outs

    # ---- BatchNorm scale/shift, computed once (tiny, wrapper-side XLA) ----
    # TODO(synk): BatchNorm affine (gamma/beta) and running-stat updates are
    # not emulated (PyTorch init gamma=1, beta=0 is assumed).
    n = float(bs * length)

    def _scale_shift(s_arr, q_arr):
        s = jnp.sum(s_arr, axis=(0, 1))                             # (out,)
        q = jnp.sum(q_arr, axis=(0, 1))
        mean = s / n
        var = jnp.maximum(q / n - mean * mean, 0.0)                 # clamp cancellation
        scale = lax.rsqrt(var + _EPS)
        shift = -mean * scale
        return scale.reshape(out_c, 1), shift.reshape(out_c, 1)

    scale_c, shift_c = _scale_shift(c_sum, c_sq)

    # ---------------- Pass 2: BN apply + residual add + LeakyReLU ----------------
    l_tile = length if length <= _L_TILE_CAP else _L_TILE_CAP
    n_lt = pl.cdiv(length, l_tile)

    if has_res:
        scale_r, shift_r = _scale_shift(r_sum, r_sq)
        shift_total = shift_c + shift_r
        bn_inputs = [y_conv, y_res, scale_c, scale_r, shift_total]
        bn_in_specs = [
            pl.BlockSpec((1, out_c, l_tile), lambda b, l: (b, 0, l)),
            pl.BlockSpec((1, out_c, l_tile), lambda b, l: (b, 0, l)),
            _const_spec((out_c, 1), lambda b, l: (0, 0)),
            _const_spec((out_c, 1), lambda b, l: (0, 0)),
            _const_spec((out_c, 1), lambda b, l: (0, 0)),
        ]
    else:
        bn_inputs = [y_conv, x, scale_c, shift_c]
        bn_in_specs = [
            pl.BlockSpec((1, out_c, l_tile), lambda b, l: (b, 0, l)),
            pl.BlockSpec((1, in_c, l_tile), lambda b, l: (b, 0, l)),
            _const_spec((out_c, 1), lambda b, l: (0, 0)),
            _const_spec((out_c, 1), lambda b, l: (0, 0)),
        ]

    out = pl.pallas_call(
        _make_bn_act_kernel(has_res),
        grid=(bs, n_lt),
        in_specs=bn_in_specs,
        out_specs=pl.BlockSpec((1, out_c, l_tile), lambda b, l: (b, 0, l)),
        out_shape=jax.ShapeDtypeStruct((bs, out_c, length), x.dtype),
        compiler_params=pltpu.CompilerParams(
            dimension_semantics=("parallel", "parallel"),
            vmem_limit_bytes=_VMEM_LIMIT),
    )(*bn_inputs)
    return out


# ---------------------------------------------------------------------------
# Pure-JAX reference of the PyTorch forward (training-mode BN), for parity.
# ---------------------------------------------------------------------------
def _reference(x, params, kernel_size):
    bs, in_c, L = x.shape
    out_c = params["weight"].shape[1]
    pad = (kernel_size - 1) // 2
    pooled = jnp.mean(x, axis=2)                                    # (bs, in)
    logits = jnp.einsum("kc,bc->bk", params["att_w"][:, :, 0], pooled)
    logits = logits + params["att_b"][None, :]
    att = jax.nn.softmax(logits, axis=1)                            # (bs, K)
    mixed_w = jnp.einsum("bk,kocs->bocs", att, params["weight"])
    mixed_b = att @ params["bias"]                                  # (bs, out)
    xp = jnp.pad(x, ((0, 0), (0, 0), (pad, pad)))
    cols = jnp.stack([xp[:, :, k:k + L] for k in range(kernel_size)], axis=-1)
    y = jnp.einsum("bocs,bcls->bol", mixed_w, cols) + mixed_b[:, :, None]

    def bn(z):
        mean = jnp.mean(z, axis=(0, 2), keepdims=True)
        var = jnp.mean((z - mean) ** 2, axis=(0, 2), keepdims=True)
        return (z - mean) / jnp.sqrt(var + _EPS)

    out = bn(y)
    if in_c != out_c:
        r = jnp.einsum("oc,bcl->bol", params["res_w"][:, :, 0], x)
        r = r + params["res_b"][None, :, None]
        out = out + bn(r)
    else:
        out = out + x
    return jnp.where(out >= 0, out, _NEG_SLOPE * out)


if __name__ == "__main__":
    bs, in_planes, out_planes, L = 2, 4, 8, 16
    kernel_size, K = 3, 4

    keys = jax.random.split(jax.random.PRNGKey(0), 7)
    x = jax.random.normal(keys[0], (bs, in_planes, L), jnp.float32)
    params = {
        # nn.Parameter(torch.randn(K, out, in, ks))
        "weight": jax.random.normal(
            keys[1], (K, out_planes, in_planes, kernel_size), jnp.float32),
        # nn.Parameter(torch.randn(K, out))
        "bias": jax.random.normal(keys[2], (K, out_planes), jnp.float32),
        # Attention.net = Conv1d(in, K, 1): weight (K, in, 1), bias (K,)
        "att_w": jax.random.normal(keys[3], (K, in_planes, 1), jnp.float32) * 0.5,
        "att_b": jax.random.normal(keys[4], (K,), jnp.float32) * 0.1,
        # res = Conv1d(in, out, 1): weight (out, in, 1), bias (out,)
        "res_w": jax.random.normal(keys[5], (out_planes, in_planes, 1), jnp.float32) * 0.5,
        "res_b": jax.random.normal(keys[6], (out_planes,), jnp.float32) * 0.1,
    }

    # projection-shortcut path (in != out): default fast config (bf16 inter).
    out = res_dyconv1d_block(x, params, kernel_size=kernel_size)
    jax.block_until_ready(out)
    assert out.shape == (bs, out_planes, L)
    assert bool(jnp.all(jnp.isfinite(out)))

    # full-f32 config checked against the pure-JAX reference.
    out_f32 = res_dyconv1d_block(x, params, kernel_size=kernel_size,
                                 matmul_dtype=jnp.float32,
                                 intermediate_dtype=jnp.float32)
    jax.block_until_ready(out_f32)
    ref = _reference(x, params, kernel_size)
    assert bool(jnp.allclose(out_f32, ref, rtol=2e-2, atol=2e-2))

    # identity-shortcut path (in == out).
    keys2 = jax.random.split(jax.random.PRNGKey(1), 3)
    x2 = jax.random.normal(keys2[0], (bs, in_planes, L), jnp.float32)
    params2 = {
        "weight": jax.random.normal(
            keys2[1], (K, in_planes, in_planes, kernel_size), jnp.float32),
        "bias": jax.random.normal(keys2[2], (K, in_planes), jnp.float32),
        "att_w": params["att_w"],
        "att_b": params["att_b"],
        "res_w": jnp.zeros((in_planes, in_planes, 1), jnp.float32),  # unused here
        "res_b": jnp.zeros((in_planes,), jnp.float32),
    }
    out2 = res_dyconv1d_block(x2, params2, kernel_size=kernel_size,
                              matmul_dtype=jnp.float32,
                              intermediate_dtype=jnp.float32)
    jax.block_until_ready(out2)
    assert out2.shape == (bs, in_planes, L)
    ref2 = _reference(x2, params2, kernel_size)
    assert bool(jnp.allclose(out2, ref2, rtol=2e-2, atol=2e-2))

    print("KERNEL_OK")
</pallas_src>

<mosaic_0001>
module attributes {stable_mosaic.version = 11 : i64} {
  func.func @kernel(%arg0: i32, %arg1: memref<1x4x16xf32, #tpu.memory_space<vmem>>, %arg2: memref<4x4xf32, #tpu.memory_space<vmem>>, %arg3: memref<4x1xf32, #tpu.memory_space<vmem>>, %arg4: memref<4x8x12xf32, #tpu.memory_space<vmem>>, %arg5: memref<8x4xf32, #tpu.memory_space<vmem>>, %arg6: memref<8x4xf32, #tpu.memory_space<vmem>>, %arg7: memref<8x1xf32, #tpu.memory_space<vmem>>, %arg8: memref<1x8x16xbf16, #tpu.memory_space<vmem>>, %arg9: memref<1x1x8xf32, #tpu.memory_space<vmem>>, %arg10: memref<1x1x8xf32, #tpu.memory_space<vmem>>, %arg11: memref<1x8x16xbf16, #tpu.memory_space<vmem>>, %arg12: memref<1x1x8xf32, #tpu.memory_space<vmem>>, %arg13: memref<1x1x8xf32, #tpu.memory_space<vmem>>) attributes {dimension_semantics = [#tpu.dimension_semantics<parallel>], iteration_bounds = array<i64: 2>, scalar_prefetch = 0 : i64, scratch_operands = 0 : i64, tpu.core_type = #tpu.core_type<tc>, window_params = [{transform_indices = @transform_0, window_bounds = array<i64: 1, 4, 16>}, {pipeline_mode = #tpu.pipeline_mode<synchronous>, transform_indices = @transform_1, window_bounds = array<i64: 4, 4>}, {pipeline_mode = #tpu.pipeline_mode<synchronous>, transform_indices = @transform_2, window_bounds = array<i64: 4, 1>}, {pipeline_mode = #tpu.pipeline_mode<synchronous>, transform_indices = @transform_3, window_bounds = array<i64: 4, 8, 12>}, {pipeline_mode = #tpu.pipeline_mode<synchronous>, transform_indices = @transform_4, window_bounds = array<i64: 8, 4>}, {pipeline_mode = #tpu.pipeline_mode<synchronous>, transform_indices = @transform_5, window_bounds = array<i64: 8, 4>}, {pipeline_mode = #tpu.pipeline_mode<synchronous>, transform_indices = @transform_6, window_bounds = array<i64: 8, 1>}, {transform_indices = @transform_7, window_bounds = array<i64: 1, 8, 16>}, {transform_indices = @transform_8, window_bounds = array<i64: 1, 1, 8>}, {transform_indices = @transform_9, window_bounds = array<i64: 1, 1, 8>}, {transform_indices = @transform_10, window_bounds = array<i64: 1, 8, 16>}, {transform_indices = @transform_11, window_bounds = array<i64: 1, 1, 8>}, {transform_indices = @transform_12, window_bounds = array<i64: 1, 1, 8>}]} {
    %c0 = arith.constant 0 : index
    %c0_0 = arith.constant 0 : index
    %c0_1 = arith.constant 0 : index
    %0 = vector.load %arg1[%c0, %c0_0, %c0_1] : memref<1x4x16xf32, #tpu.memory_space<vmem>>, vector<1x4x16xf32>
    %1 = vector.shape_cast %0 : vector<1x4x16xf32> to vector<4x16xf32>
    %cst = arith.constant dense<0.000000e+00> : vector<4xf32>
    %2 = vector.multi_reduction <add>, %1, %cst [1] : vector<4x16xf32> to vector<4xf32>
    %3 = vector.shape_cast %2 : vector<4xf32> to vector<4x1xf32>
    %cst_2 = arith.constant 6.250000e-02 : f32
    %4 = vector.broadcast %cst_2 : f32 to vector<4x1xf32>
    %5 = arith.mulf %3, %4 : vector<4x1xf32>
    %c0_3 = arith.constant 0 : index
    %c0_4 = arith.constant 0 : index
    %6 = vector.load %arg2[%c0_3, %c0_4] : memref<4x4xf32, #tpu.memory_space<vmem>>, vector<4x4xf32>
    %cst_5 = arith.constant dense<0.000000e+00> : vector<4x1xf32>
    %7 = tpu.matmul %6, %5, %cst_5 {dimension_numbers = #tpu.dot_dimension_numbers<[1], [0], [0], [1], [0, 0, 1, 1], [], []>} : vector<4x4xf32>, vector<4x1xf32>, vector<4x1xf32> -> vector<4x1xf32>
    %c0_6 = arith.constant 0 : index
    %c0_7 = arith.constant 0 : index
    %8 = vector.load %arg3[%c0_6, %c0_7] : memref<4x1xf32, #tpu.memory_space<vmem>>, vector<4x1xf32>
    %9 = arith.addf %7, %8 : vector<4x1xf32>
    %cst_8 = arith.constant dense<0xFF800000> : vector<1xf32>
    %10 = vector.multi_reduction <maximumf>, %9, %cst_8 [0] : vector<4x1xf32> to vector<1xf32>
    %11 = vector.shape_cast %10 : vector<1xf32> to vector<1x1xf32>
    %12 = vector.broadcast %11 : vector<1x1xf32> to vector<4x1xf32>
    %13 = arith.subf %9, %12 : vector<4x1xf32>
    %14 = math.exp %13 : vector<4x1xf32>
    %cst_9 = arith.constant dense<0.000000e+00> : vector<1xf32>
    %15 = vector.multi_reduction <add>, %14, %cst_9 [0] : vector<4x1xf32> to vector<1xf32>
    %16 = vector.shape_cast %15 : vector<1xf32> to vector<1x1xf32>
    %17 = vector.broadcast %16 : vector<1x1xf32> to vector<4x1xf32>
    %18 = arith.divf %14, %17 : vector<4x1xf32>
    %19 = vector.extract_strided_slice %18 {offsets = [0, 0], sizes = [1, 1], strides = [1, 1]} : vector<4x1xf32> to vector<1x1xf32>
    %c0_10 = arith.constant 0 : index
    %c0_11 = arith.constant 0 : index
    %c0_12 = arith.constant 0 : index
    %20 = vector.load %arg4[%c0_10, %c0_11, %c0_12] : memref<4x8x12xf32, #tpu.memory_space<vmem>>, vector<1x8x12xf32>
    %21 = vector.shape_cast %20 : vector<1x8x12xf32> to vector<8x12xf32>
    %22 = vector.broadcast %19 : vector<1x1xf32> to vector<8x12xf32>
    %23 = arith.mulf %22, %21 : vector<8x12xf32>
    %24 = vector.extract_strided_slice %18 {offsets = [1, 0], sizes = [1, 1], strides = [1, 1]} : vector<4x1xf32> to vector<1x1xf32>
    %c1 = arith.constant 1 : index
    %c0_13 = arith.constant 0 : index
    %c0_14 = arith.constant 0 : index
    %25 = vector.load %arg4[%c1, %c0_13, %c0_14] : memref<4x8x12xf32, #tpu.memory_space<vmem>>, vector<1x8x12xf32>
    %26 = vector.shape_cast %25 : vector<1x8x12xf32> to vector<8x12xf32>
    %27 = vector.broadcast %24 : vector<1x1xf32> to vector<8x12xf32>
    %28 = arith.mulf %27, %26 : vector<8x12xf32>
    %29 = arith.addf %23, %28 : vector<8x12xf32>
    %30 = vector.extract_strided_slice %18 {offsets = [2, 0], sizes = [1, 1], strides = [1, 1]} : vector<4x1xf32> to vector<1x1xf32>
    %c2 = arith.constant 2 : index
    %c0_15 = arith.constant 0 : index
    %c0_16 = arith.constant 0 : index
    %31 = vector.load %arg4[%c2, %c0_15, %c0_16] : memref<4x8x12xf32, #tpu.memory_space<vmem>>, vector<1x8x12xf32>
    %32 = vector.shape_cast %31 : vector<1x8x12xf32> to vector<8x12xf32>
    %33 = vector.broadcast %30 : vector<1x1xf32> to vector<8x12xf32>
    %34 = arith.mulf %33, %32 : vector<8x12xf32>
    %35 = arith.addf %29, %34 : vector<8x12xf32>
    %36 = vector.extract_strided_slice %18 {offsets = [3, 0], sizes = [1, 1], strides = [1, 1]} : vector<4x1xf32> to vector<1x1xf32>
    %c3 = arith.constant 3 : index
    %c0_17 = arith.constant 0 : index
    %c0_18 = arith.constant 0 : index
    %37 = vector.load %arg4[%c3, %c0_17, %c0_18] : memref<4x8x12xf32, #tpu.memory_space<vmem>>, vector<1x8x12xf32>
    %38 = vector.shape_cast %37 : vector<1x8x12xf32> to vector<8x12xf32>
    %39 = vector.broadcast %36 : vector<1x1xf32> to vector<8x12xf32>
    %40 = arith.mulf %39, %38 : vector<8x12xf32>
    %41 = arith.addf %35, %40 : vector<8x12xf32>
    %c0_19 = arith.constant 0 : index
    %c0_20 = arith.constant 0 : index
    %42 = vector.load %arg5[%c0_19, %c0_20] : memref<8x4xf32, #tpu.memory_space<vmem>>, vector<8x4xf32>
    %cst_21 = arith.constant dense<0.000000e+00> : vector<8x1xf32>
    %43 = tpu.matmul %42, %18, %cst_21 {dimension_numbers = #tpu.dot_dimension_numbers<[1], [0], [0], [1], [0, 0, 1, 1], [], []>} : vector<8x4xf32>, vector<4x1xf32>, vector<8x1xf32> -> vector<8x1xf32>
    %cst_22 = arith.constant 0.000000e+00 : f32
    %44 = vector.broadcast %cst_22 : f32 to vector<4x1xf32>
    %45 = vector.extract_strided_slice %1 {offsets = [0, 0], sizes = [4, 15], strides = [1, 1]} : vector<4x16xf32> to vector<4x15xf32>
    %46 = tpu.concatenate %44, %45 in 1 : vector<4x1xf32>, vector<4x15xf32> -> vector<4x16xf32>
    %47 = vector.extract_strided_slice %41 {offsets = [0, 0], sizes = [8, 4], strides = [1, 1]} : vector<8x12xf32> to vector<8x4xf32>
    %cst_23 = arith.constant dense<0.000000e+00> : vector<8x16xf32>
    %48 = tpu.matmul %47, %46, %cst_23 {dimension_numbers = #tpu.dot_dimension_numbers<[1], [0], [0], [1], [0, 0, 1, 1], [], []>} : vector<8x4xf32>, vector<4x16xf32>, vector<8x16xf32> -> vector<8x16xf32>
    %49 = vector.extract_strided_slice %41 {offsets = [0, 4], sizes = [8, 4], strides = [1, 1]} : vector<8x12xf32> to vector<8x4xf32>
    %cst_24 = arith.constant dense<0.000000e+00> : vector<8x16xf32>
    %50 = tpu.matmul %49, %1, %cst_24 {dimension_numbers = #tpu.dot_dimension_numbers<[1], [0], [0], [1], [0, 0, 1, 1], [], []>} : vector<8x4xf32>, vector<4x16xf32>, vector<8x16xf32> -> vector<8x16xf32>
    %51 = arith.addf %48, %50 : vector<8x16xf32>
    %52 = vector.extract_strided_slice %1 {offsets = [0, 1], sizes = [4, 15], strides = [1, 1]} : vector<4x16xf32> to vector<4x15xf32>
    %cst_25 = arith.constant 0.000000e+00 : f32
    %53 = vector.broadcast %cst_25 : f32 to vector<4x1xf32>
    %54 = tpu.concatenate %52, %53 in 1 : vector<4x15xf32>, vector<4x1xf32> -> vector<4x16xf32>
    %55 = vector.extract_strided_slice %41 {offsets = [0, 8], sizes = [8, 4], strides = [1, 1]} : vector<8x12xf32> to vector<8x4xf32>
    %cst_26 = arith.constant dense<0.000000e+00> : vector<8x16xf32>
    %56 = tpu.matmul %55, %54, %cst_26 {dimension_numbers = #tpu.dot_dimension_numbers<[1], [0], [0], [1], [0, 0, 1, 1], [], []>} : vector<8x4xf32>, vector<4x16xf32>, vector<8x16xf32> -> vector<8x16xf32>
    %57 = arith.addf %51, %56 : vector<8x16xf32>
    %58 = vector.broadcast %43 : vector<8x1xf32> to vector<8x16xf32>
    %59 = arith.addf %57, %58 : vector<8x16xf32>
    %60 = arith.truncf %59 : vector<8x16xf32> to vector<8x16xbf16>
    %c0_27 = arith.constant 0 : index
    %c0_28 = arith.constant 0 : index
    %c0_29 = arith.constant 0 : index
    %61 = vector.load %arg8[%c0_27, %c0_28, %c0_29] : memref<1x8x16xbf16, #tpu.memory_space<vmem>>, vector<1x8x16xbf16>
    %62 = vector.shape_cast %61 : vector<1x8x16xbf16> to vector<8x16xbf16>
    %63 = vector.shape_cast %60 : vector<8x16xbf16> to vector<1x8x16xbf16>
    tpu.vector_store %arg8[%c0_27, %c0_28, %c0_29], %63 {strides = array<i32>} : memref<1x8x16xbf16, #tpu.memory_space<vmem>>, vector<1x8x16xbf16>,
    %cst_30 = arith.constant dense<0.000000e+00> : vector<8xf32>
    %64 = vector.multi_reduction <add>, %59, %cst_30 [1] : vector<8x16xf32> to vector<8xf32>
    %65 = vector.shape_cast %64 : vector<8xf32> to vector<8x1xf32>
    %66 = vector.shape_cast %65 : vector<8x1xf32> to vector<1x8xf32>
    %c0_31 = arith.constant 0 : index
    %c0_32 = arith.constant 0 : index
    %c0_33 = arith.constant 0 : index
    %67 = vector.load %arg9[%c0_31, %c0_32, %c0_33] : memref<1x1x8xf32, #tpu.memory_space<vmem>>, vector<1x1x8xf32>
    %68 = vector.shape_cast %67 : vector<1x1x8xf32> to vector<1x8xf32>
    %69 = vector.shape_cast %66 : vector<1x8xf32> to vector<1x1x8xf32>
    tpu.vector_store %arg9[%c0_31, %c0_32, %c0_33], %69 {strides = array<i32>} : memref<1x1x8xf32, #tpu.memory_space<vmem>>, vector<1x1x8xf32>,
    %70 = arith.mulf %59, %59 : vector<8x16xf32>
    %cst_34 = arith.constant dense<0.000000e+00> : vector<8xf32>
    %71 = vector.multi_reduction <add>, %70, %cst_34 [1] : vector<8x16xf32> to vector<8xf32>
    %72 = vector.shape_cast %71 : vector<8xf32> to vector<8x1xf32>
    %73 = vector.shape_cast %72 : vector<8x1xf32> to vector<1x8xf32>
    %c0_35 = arith.constant 0 : index
    %c0_36 = arith.constant 0 : index
    %c0_37 = arith.constant 0 : index
    %74 = vector.load %arg10[%c0_35, %c0_36, %c0_37] : memref<1x1x8xf32, #tpu.memory_space<vmem>>, vector<1x1x8xf32>
    %75 = vector.shape_cast %74 : vector<1x1x8xf32> to vector<1x8xf32>
    %76 = vector.shape_cast %73 : vector<1x8xf32> to vector<1x1x8xf32>
    tpu.vector_store %arg10[%c0_35, %c0_36, %c0_37], %76 {strides = array<i32>} : memref<1x1x8xf32, #tpu.memory_space<vmem>>, vector<1x1x8xf32>,
    %c0_38 = arith.constant 0 : index
    %c0_39 = arith.constant 0 : index
    %77 = vector.load %arg6[%c0_38, %c0_39] : memref<8x4xf32, #tpu.memory_space<vmem>>, vector<8x4xf32>
    %cst_40 = arith.constant dense<0.000000e+00> : vector<8x16xf32>
    %78 = tpu.matmul %77, %1, %cst_40 {dimension_numbers = #tpu.dot_dimension_numbers<[1], [0], [0], [1], [0, 0, 1, 1], [], []>} : vector<8x4xf32>, vector<4x16xf32>, vector<8x16xf32> -> vector<8x16xf32>
    %c0_41 = arith.constant 0 : index
    %c0_42 = arith.constant 0 : index
    %79 = vector.load %arg7[%c0_41, %c0_42] : memref<8x1xf32, #tpu.memory_space<vmem>>, vector<8x1xf32>
    %80 = vector.broadcast %79 : vector<8x1xf32> to vector<8x16xf32>
    %81 = arith.addf %78, %80 : vector<8x16xf32>
    %82 = arith.truncf %81 : vector<8x16xf32> to vector<8x16xbf16>
    %c0_43 = arith.constant 0 : index
    %c0_44 = arith.constant 0 : index
    %c0_45 = arith.constant 0 : index
    %83 = vector.load %arg11[%c0_43, %c0_44, %c0_45] : memref<1x8x16xbf16, #tpu.memory_space<vmem>>, vector<1x8x16xbf16>
    %84 = vector.shape_cast %83 : vector<1x8x16xbf16> to vector<8x16xbf16>
    %85 = vector.shape_cast %82 : vector<8x16xbf16> to vector<1x8x16xbf16>
    tpu.vector_store %arg11[%c0_43, %c0_44, %c0_45], %85 {strides = array<i32>} : memref<1x8x16xbf16, #tpu.memory_space<vmem>>, vector<1x8x16xbf16>,
    %cst_46 = arith.constant dense<0.000000e+00> : vector<8xf32>
    %86 = vector.multi_reduction <add>, %81, %cst_46 [1] : vector<8x16xf32> to vector<8xf32>
    %87 = vector.shape_cast %86 : vector<8xf32> to vector<8x1xf32>
    %88 = vector.shape_cast %87 : vector<8x1xf32> to vector<1x8xf32>
    %c0_47 = arith.constant 0 : index
    %c0_48 = arith.constant 0 : index
    %c0_49 = arith.constant 0 : index
    %89 = vector.load %arg12[%c0_47, %c0_48, %c0_49] : memref<1x1x8xf32, #tpu.memory_space<vmem>>, vector<1x1x8xf32>
    %90 = vector.shape_cast %89 : vector<1x1x8xf32> to vector<1x8xf32>
    %91 = vector.shape_cast %88 : vector<1x8xf32> to vector<1x1x8xf32>
    tpu.vector_store %arg12[%c0_47, %c0_48, %c0_49], %91 {strides = array<i32>} : memref<1x1x8xf32, #tpu.memory_space<vmem>>, vector<1x1x8xf32>,
    %92 = arith.mulf %81, %81 : vector<8x16xf32>
    %cst_50 = arith.constant dense<0.000000e+00> : vector<8xf32>
    %93 = vector.multi_reduction <add>, %92, %cst_50 [1] : vector<8x16xf32> to vector<8xf32>
    %94 = vector.shape_cast %93 : vector<8xf32> to vector<8x1xf32>
    %95 = vector.shape_cast %94 : vector<8x1xf32> to vector<1x8xf32>
    %c0_51 = arith.constant 0 : index
    %c0_52 = arith.constant 0 : index
    %c0_53 = arith.constant 0 : index
    %96 = vector.load %arg13[%c0_51, %c0_52, %c0_53] : memref<1x1x8xf32, #tpu.memory_space<vmem>>, vector<1x1x8xf32>
    %97 = vector.shape_cast %96 : vector<1x1x8xf32> to vector<1x8xf32>
    %98 = vector.shape_cast %95 : vector<1x8xf32> to vector<1x1x8xf32>
    tpu.vector_store %arg13[%c0_51, %c0_52, %c0_53], %98 {strides = array<i32>} : memref<1x1x8xf32, #tpu.memory_space<vmem>>, vector<1x1x8xf32>,
    return
  }
  func.func @transform_0(%arg0: i32) -> (i32, i32, i32) {
    %c0_i32 = arith.constant 0 : i32
    %c0_i32_0 = arith.constant 0 : i32
    %c0_i32_1 = arith.constant 0 : i32
    return %arg0, %c0_i32, %c0_i32_0 : i32, i32, i32
  }
  func.func @transform_1(%arg0: i32) -> (i32, i32) {
    %c0_i32 = arith.constant 0 : i32
    %c0_i32_0 = arith.constant 0 : i32
    %c0_i32_1 = arith.constant 0 : i32
    return %c0_i32, %c0_i32_0 : i32, i32
  }
  func.func @transform_2(%arg0: i32) -> (i32, i32) {
    %c0_i32 = arith.constant 0 : i32
    %c0_i32_0 = arith.constant 0 : i32
    %c0_i32_1 = arith.constant 0 : i32
    return %c0_i32, %c0_i32_0 : i32, i32
  }
  func.func @transform_3(%arg0: i32) -> (i32, i32, i32) {
    %c0_i32 = arith.constant 0 : i32
    %c0_i32_0 = arith.constant 0 : i32
    %c0_i32_1 = arith.constant 0 : i32
    %c0_i32_2 = arith.constant 0 : i32
    return %c0_i32, %c0_i32_0, %c0_i32_1 : i32, i32, i32
  }
  func.func @transform_4(%arg0: i32) -> (i32, i32) {
    %c0_i32 = arith.constant 0 : i32
    %c0_i32_0 = arith.constant 0 : i32
    %c0_i32_1 = arith.constant 0 : i32
    return %c0_i32, %c0_i32_0 : i32, i32
  }
  func.func @transform_5(%arg0: i32) -> (i32, i32) {
    %c0_i32 = arith.constant 0 : i32
    %c0_i32_0 = arith.constant 0 : i32
    %c0_i32_1 = arith.constant 0 : i32
    return %c0_i32, %c0_i32_0 : i32, i32
  }
  func.func @transform_6(%arg0: i32) -> (i32, i32) {
    %c0_i32 = arith.constant 0 : i32
    %c0_i32_0 = arith.constant 0 : i32
    %c0_i32_1 = arith.constant 0 : i32
    return %c0_i32, %c0_i32_0 : i32, i32
  }
  func.func @transform_7(%arg0: i32) -> (i32, i32, i32) {
    %c0_i32 = arith.constant 0 : i32
    %c0_i32_0 = arith.constant 0 : i32
    %c0_i32_1 = arith.constant 0 : i32
    return %arg0, %c0_i32, %c0_i32_0 : i32, i32, i32
  }
  func.func @transform_8(%arg0: i32) -> (i32, i32, i32) {
    %c0_i32 = arith.constant 0 : i32
    %c0_i32_0 = arith.constant 0 : i32
    %c0_i32_1 = arith.constant 0 : i32
    return %arg0, %c0_i32, %c0_i32_0 : i32, i32, i32
  }
  func.func @transform_9(%arg0: i32) -> (i32, i32, i32) {
    %c0_i32 = arith.constant 0 : i32
    %c0_i32_0 = arith.constant 0 : i32
    %c0_i32_1 = arith.constant 0 : i32
    return %arg0, %c0_i32, %c0_i32_0 : i32, i32, i32
  }
  func.func @transform_10(%arg0: i32) -> (i32, i32, i32) {
    %c0_i32 = arith.constant 0 : i32
    %c0_i32_0 = arith.constant 0 : i32
    %c0_i32_1 = arith.constant 0 : i32
    return %arg0, %c0_i32, %c0_i32_0 : i32, i32, i32
  }
  func.func @transform_11(%arg0: i32) -> (i32, i32, i32) {
    %c0_i32 = arith.constant 0 : i32
    %c0_i32_0 = arith.constant 0 : i32
    %c0_i32_1 = arith.constant 0 : i32
    return %arg0, %c0_i32, %c0_i32_0 : i32, i32, i32
  }
  func.func @transform_12(%arg0: i32) -> (i32, i32, i32) {
    %c0_i32 = arith.constant 0 : i32
    %c0_i32_0 = arith.constant 0 : i32
    %c0_i32_1 = arith.constant 0 : i32
    return %arg0, %c0_i32, %c0_i32_0 : i32, i32, i32
  }
}

</mosaic_0001>

<bundles_post_ra>
// kernel: tpu_custom_call.1
= control target key start
LH: loop header
LB: loop body
LE: loop exit
PB: predicated region body
PF: predicated region fallthrough
CT: control target
= control target key end

     0   :  { %s2207_s0 = inlined_call_operand.vmem [shape: f32[2,4,16], index: 0, kind: input, shape index: {}]   ;;  %s2208_s1 = inlined_call_operand.hbm [shape: f32[4,4], index: 1, kind: input, shape index: {}]   ;;  %s2209_s2 = inlined_call_operand.vmem [shape: f32[4,1], index: 2, kind: input, shape index: {}]   ;;  %s2210_s3 = inlined_call_operand.vmem [shape: f32[4,8,12], index: 3, kind: input, shape index: {}]   ;;  %s2211_s4 = inlined_call_operand.vmem [shape: f32[8,4], index: 4, kind: input, shape index: {}]   ;;  %s2212_s5 = inlined_call_operand.vmem [shape: f32[8,4], index: 5, kind: input, shape index: {}]   ;;  %s2213_s6 = inlined_call_operand.vmem [shape: f32[8,1], index: 6, kind: input, shape index: {}]   ;;  %s2214_s7 = inlined_call_operand.hbm [shape: bf16[2,8,16], index: 7, kind: output, shape index: {0}]   ;;  %s2215_s8 = inlined_call_operand.hbm [shape: f32[2,1,8], index: 8, kind: output, shape index: {1}]   ;;  %s2216_s9 = inlined_call_operand.hbm [shape: f32[2,1,8], index: 9, kind: output, shape index: {2}]   ;;  %s2217_s10 = inlined_call_operand.hbm [shape: bf16[2,8,16], index: 10, kind: output, shape index: {3}]   ;;  %s2218_s11 = inlined_call_operand.hbm [shape: f32[2,1,8], index: 11, kind: output, shape index: {4}]   ;;  %s2219_s12 = inlined_call_operand.hbm [shape: f32[2,1,8], index: 12, kind: output, shape index: {5}]  }
   0x1   :  { %2226 = sst [smem:[#allocation20_spill]] %s2207_s0 }
   0x2   :  { %2227 = sst [smem:[#allocation21_spill]] %s2208_s1 }
   0x3   :  { %2228 = sst [smem:[#allocation22_spill]] %s2209_s2 }
   0x4   :  { %2229 = sst [smem:[#allocation23_spill]] %s2210_s3 }
   0x5   :  { %2230 = sst [smem:[#allocation24_spill]] %s2211_s4 }
   0x6   :  { %2231 = sst [smem:[#allocation25_spill]] %s2212_s5 }
   0x7   :  { %2232 = sst [smem:[#allocation26_spill]] %s2213_s6 }
   0x8   :  { %2233 = sst [smem:[#allocation27_spill]] %s2214_s7 }
   0x9   :  { %2234 = sst [smem:[#allocation28_spill]] %s2217_s10 }
   0xa   :  { %18 = vsyncpa [#allocation3], 0 }
   0xb   :  { %19 = vsyncpa [#allocation4], 0 }
   0xc   :  { %21 = vsyncpa [#allocation4 + $0x1], 0 }
   0xd   :  { %22 = vsyncpa [#allocation7], 0 }
   0xe   :  { %24 = vsyncpa [#allocation7 + $0x1], 0 }
   0xf   :  { %25 = vsyncpa [#allocation10], 0 }
  0x10   :  { %27 = vsyncpa [#allocation10 + $0x1], 0 }
  0x11   :  { %28 = vsyncpa [#allocation13], 0 }
  0x12   :  { %30 = vsyncpa [#allocation13 + $0x1], 0  ;;  %s1846_s21 = smov 0   ;;  %s1848_s22 = smov 0  }
  0x13   :  { %s1850_s23 = smov 0   ;;  %s1852_s24 = smov 0  }
  0x14 LB: > { %s1867_s25 = sadd.s32 4294967295, %s1765_s24   ;;  %s2220_s26 = sadd.s32 4294967294, %s1765_s24   ;;  %s1765_s24 = sphi %s1852_s24, %s2259_s24   ;;  %s1761_s23 = sphi %s1850_s23, %s2258_s23   ;;  %s1757_s22 = sphi %s1848_s22, %s2257_s22   ;;  %s1753_s21 = sphi %s1846_s21, %s2256_s21  }
  0x15   : > { %s1871_s27 = sadd.s32 1, %s1765_s24   ;;  %s195_s28 = sadd.s32 1, %s1761_s23 }
  0x16   : > { %s192_s29 = ssub.s32 %s1765_s24, %s1871_s27  ;;  %p205_p0 = scmp.ne.s32.totalorder %s1761_s23, %s1757_s22 }
  0x17   : > { %p193_p1 = scmp.eq.s32.totalorder %s192_s29, 0  ;;  %p206_p2 = scmp.eq.s32.totalorder %s1867_s25, 1 }
  0x18   : > { %p211_p3 = scmp.ne.s32.totalorder %s1757_s22, %s1753_s21  ;;  %p212_p4 = scmp.eq.s32.totalorder %s2220_s26, 1 }
  0x19   : > { %s1884_s30 = scalar_select %p193_p1, %s1761_s23, %s195_s28  }
  0x1a   : > { %p1886_p5 = por %p206_p2, %p205_p0  ;;  %p1890_p6 = por %p212_p4, %p211_p3 }
  0x1b   : > { %2235 = sst [smem:[#allocation19_spill]] %s1884_s30  ;;  %p1362_p7 = scmp.ge.s32.totalorder %s1765_s24, 1 }
  0x1c   : > { %s2237_s14 = scalar_select %p1890_p6, 1, 0 }
  0x1d   : > { %p349_p8 = scmp.lt.s32.totalorder %s1765_s24, 3  ;;  %p1484_p9 = scmp.eq.s32.totalorder %s1867_s25, 0 }
  0x1e   : > { %s1767_s16 = smov [#allocation2]  }
  0x1f   : > { %p1897_p10 = pnand %p1362_p7, %p349_p8  ;;  %s362_s17 = sshll.u32 %s1767_s16, 4  ;;  %s363_s17 = int_to_ptr.vmem [resolvable:$true] %s362_s17 }
  0x20   : > { %s1544_s18 = scalar_lea.vmem %s363_s17, 64  ;;  %p1552_p3 = scmp.lt.s32.totalorder %s363_s17, %s363_s17 }
  0x21   : > { %p1461_p11 = pneg %p1897_p10  ;;  %p1545_p0 = scmp.ne.s32.totalorder %s363_s17, %s1544_s18 }
  0x22   : > { %p1553_p4 = scmp.lt.s32.totalorder %s1544_s18, %s1544_s18 }
  0x23   : > { %p1462_p12 = pnand %p1484_p9, %p1461_p11 }
  0x24   : > { %p1554_p6 = por %p1553_p4, %p1552_p3 }
  0x25   : > { %p1535_p13 = pneg %p1462_p12 }
  0x27   : > { %p1547_p1 = pnand %p1545_p0, %p1535_p13 }
  0x29   : > { %p1548_p2 = pneg %p1547_p1 }
  0x2b   : > { %p1555_p7 = pnand %p1554_p6, %p1548_p2 }
  0x2d   : > { %1558 = shalt.err (!%p1555_p7)
}
  0x2e   : > { %s2239_s1 = sld [smem:[#allocation21_spill]] }
  0x30   : > { %397 = sbr.rel (%p1897_p10) target bundleno = 1063 (0x427), region = 48 }
  0x34   : > { %1464 = dma.hbm_to_vmem [thread:$0]  (!%p1462_p12), %s2239_s1, 64, %s363_s17, [#allocation3]  }
  0x35   : > { %1732 = dma.done.wait (%p1484_p9), [#allocation3], 64  }
  0x36   : > { %1734 = vsyncadd (%p1484_p9), [#allocation3], 4294967232  ;;  %p459_p8 = scmp.lt.s32.totalorder %s1867_s25, 1  ;;  %s2240_s0 = sld [smem:[#allocation20_spill]]  ;;  %vm464_vm0 = vcmask 125952   ;;  %v1768_v2 = vmov 0.0  }
  0x37   : > { %1407 = vmatprep.subr.mxu0 %v1768_v2  ;;  %1412 = vmatprep.subr.mxu1 %v1768_v2  ;;  %vm1769_vm1 = vmmov 0   ;;  %vm475_vm2 = vcmask 1043456   ;;  %v469_v5 = vld [vmem:[#allocation2] sm:$0xf]  ;;  %vm471_vm3 = vcmask 31744   ;;  %s1771_s15 = smov 127  }
  0x38   : > { %s460_s28 = scalar_select %p459_p8, %s1867_s25, 1  ;;  %1409 = vmatprep.mubr.msk.f32.mxu0 %vm1769_vm1, %v1768_v2  ;;  %1414 = vmatprep.mubr.msk.f32.mxu1 %vm1769_vm1, %v1768_v2  ;;  %vm549_vm4 = vcmask 3072   ;;  %vm679_vm5 = vcmask 7168   ;;  %v1772_v43 = vmov 0   ;;  %vm836_vm6 = vcmask 121856  }
  0x39   : > { %s2241_s2 = sld [smem:[#allocation22_spill]]  ;;  %1527 = vset.pattern.permute.xlu1 %v1772_v43  ;;  %1528 = vset.pattern.permute.xlu0 %v1772_v43  ;;  %s1773_s18 = smov 124   ;;  %vm924_vm7 = vcmask 130048  }
  0x3a   : > { %s1369_s29 = sshll.u32 %s460_s28, 2  ;;  %s2242_s4 = sld [smem:[#allocation24_spill]] }
  0x3b   : > { %s2243_s3 = sld [smem:[#allocation23_spill]]  ;;  %s1982_s20 = sand.u32 1, %s1757_s22  }
  0x3c   : > { %s462_s26 = scalar_lea.vmem %s2240_s0, %s1369_s29  ;;  %s2244_s5 = sld [smem:[#allocation25_spill]] }
  0x3d   : > { %v1919_v0 = vld [vmem:[%s462_s26] sm:$0xf]  ;;  %s1770_s26 = smov 1   ;;  %s2245_s6 = sld [smem:[#allocation26_spill]] }
  0x3e   : > { %v465_v1 = vsel %vm464_vm0, %v1919_v0, 0.0  ;;  %833 = vrot.lane.b32.xlu1 %v1919_v0, %s1771_s15  ;;  %s2246_s10 = sld [smem:[#allocation28_spill]] }
  0x3f   : > { %466 = vadd.xlane.f32.xlu0 %v465_v1  ;;  %v470_v6 = vld [vmem:[%s2241_s2] sm:$0xf]  ;;  %s1775_s2 = smov [#allocation9]  }
  0x40   : > { %v599_v30 = vld [vmem:[%s2242_s4] sm:$0xff] }
  0x41   : > { %v569_v35 = vld [vmem:[%s2243_s3] sm:$0xff]  ;;  %v1372_v37 = vld [vmem:[%s2243_s3 + $0x8] sm:$0xff]  ;;  %v1373_v39 = vld [vmem:[%s2243_s3 + $0x10] sm:$0xff] }
  0x42   : > { %v1374_v44 = vld [vmem:[%s2243_s3 + $0x18] sm:$0xff]  ;;  %v949_v51 = vld [vmem:[%s2244_s5] sm:$0xff]  ;;  %s1563_s3 = sshll.u32 %s1775_s2, 4  ;;  %s1564_s3 = int_to_ptr.vmem [resolvable:$false] %s1563_s3 }
  0x43   : > { %v950_v58 = vld [vmem:[%s2245_s6] sm:$0xff]  ;;  %s1565_s4 = scalar_lea.vmem %s1564_s3, 128 }
  0x55   : > { %676 = vrot.lane.b32.xlu0 %v1919_v0, %s1770_s26  ;;  %s2222_s26 = sshll.u32 %s1867_s25, 6 }
  0xb0   : > { %v834_v52 = vpop.permute.xlu1 %833 }
  0xb1   : > { %v837_v54 = vsel %vm836_vm6, %v834_v52, 0.0 }
  0xc8   : > { %v467_v3 = vpop.xlane.xlu0 %466 }
  0xc9   : > { %v468_v4 = vmul.f32 0.0625, %v467_v3 }
  0xcb   : > { %1408 = vmatpush3.msk.msra.mxu0 %vm475_vm2, %v468_v4 }
  0xcc   : > { %1410 = vmatmul.mubr.msk.f32.vlgmr.msra.gmra.mxu0 %vm471_vm3, %v469_v5  ;;  %1417 = vmatprep.subr.mxu0 %v1768_v2  ;;  %v677_v27 = vpop.permute.xlu0 %676 }
  0xcd   : > { %1418 = vmatpush3.msk.msra.mxu0 %vm475_vm2, %v1919_v0  ;;  %1419 = vmatprep.mubr.msk.f32.mxu0 %vm1769_vm1, %v1768_v2  ;;  %v680_v31 = vsel %vm679_vm5, 0.0, %v677_v27 }
  0xce   : > { %1427 = vmatprep.subr.mxu0 %v1768_v2 }
 0x18c   : > { %v545_v7 = vpop.f32.mrf.mxu0 }
 0x18d   : > { %v546_v8 = vadd.f32 %v545_v7, %v470_v6 }
 0x18e   : > { %v1411_v9 = vpop.f32.mrf.mxu0 }
 0x18f   : > { %v550_v10 = vsel %vm549_vm4, %v546_v8, -inf }
 0x190   : > { %v551_v11 = vrot.slane %v550_v10, 4 }
 0x192   : > { %v552_v12 = vmax.f32 %v550_v10, %v551_v11 }
 0x194   : > { %v553_v13 = vrot.slane %v552_v12, 2 }
 0x196   : > { %v554_v14 = vmax.f32 %v552_v12, %v553_v13 }
 0x198   : > { %v555_v15 = vrot.slane %v554_v14, 1 }
 0x19a   : > { %v556_v16 = vmax.f32 %v554_v14, %v555_v15 }
 0x19c   : > { %v557_v17 = vsub.f32 %v546_v8, %v556_v16 }
 0x19e   : > { %v558_v18 = vmul.f32 1.442695, %v557_v17 }
 0x1a0   : > { %1529 = vpow2.f32 %v558_v18 }
 0x1ad   : > { %v1530_v19 = vpop.eup %1529 }
 0x1ae   : > { %v560_v20 = vsel %vm549_vm4, %v1530_v19, 0.0 }
 0x1af   : > { %v561_v21 = vrot.slane %v560_v20, 4 }
 0x1b1   : > { %v562_v22 = vadd.f32 %v561_v21, %v560_v20 }
 0x1b3   : > { %v563_v23 = vrot.slane %v562_v22, 2 }
 0x1b5   : > { %v564_v24 = vadd.f32 %v563_v23, %v562_v22 }
 0x1b7   : > { %v565_v25 = vrot.slane %v564_v24, 1 }
 0x1b9   : > { %v566_v26 = vadd.f32 %v565_v25, %v564_v24 }
 0x1bb   : > { %1531 = vrcp.f32 %v566_v26 }
 0x1c8   : > { %v1532_v28 = vpop.eup %1531 }
 0x1c9   : > { %v568_v29 = vmul.f32 %v1532_v28, %v1530_v19 }
 0x1cb   : > { %1437 = vpush %v568_v29  ;;  %1413 = vmatpush3.msk.msra.mxu1 %vm475_vm2, %v568_v29  ;;  %v577_v32 = vrot.slane %v568_v29, 1  ;;  %v585_v33 = vrot.slane %v568_v29, 2  ;;  %v593_v34 = vrot.slane %v568_v29, 3 }
 0x1cc   : > { %1415 = vmatmul.mubr.msk.f32.vlgmr.msra.gmra.mxu1 %vm471_vm3, %v599_v30  ;;  %1422 = vmatprep.subr.mxu1 %v1768_v2 }
 0x1cd   : > { %1439 = vpush %v577_v32  ;;  %1423 = vmatpush3.msk.msra.mxu1 %vm475_vm2, %v680_v31  ;;  %1424 = vmatprep.mubr.msk.f32.mxu1 %vm1769_vm1, %v1768_v2 }
 0x1ce   : > { %1441 = vpush %v585_v33  ;;  %1432 = vmatprep.subr.mxu1 %v1768_v2 }
 0x1cf   : > { %1443 = vpush %v593_v34 }
 0x1fc   : > { %s1438_s29 = spop %1437 }
 0x1fd   : > { %v572_v36 = vstv %s1438_s29 }
 0x1fe   : > { %s1440_s17 = spop %1439  ;;  %v574_v40 = vmul.f32 %v572_v36, %v569_v35 }
 0x1ff   : > { %v579_v38 = vstv %s1440_s17  ;;  %s1442_s28 = spop %1441  ;;  %s1124_s17 = scalar_lea.hbm %s2246_s10, %s2222_s26 }
 0x200   : > { %v581_v41 = vmul.f32 %v1372_v37, %v579_v38  ;;  %v587_v42 = vstv %s1442_s28  ;;  %s1444_s0 = spop %1443  ;;  %s1367_s28 = sshll.u32 %s1982_s20, 2 }
 0x201   : > { %v595_v45 = vstv %s1444_s0  ;;  %v589_v47 = vmul.f32 %v1373_v39, %v587_v42  ;;  %s1774_s0 = smov 120   ;;  %s446_s16 = scalar_lea.vmem [#allocation9], %s1367_s28 }
 0x202   : > { %v582_v46 = vadd.f32 %v581_v41, %v574_v40  ;;  %v597_v49 = vmul.f32 %v1374_v44, %v595_v45  ;;  %s1986_s29 = scalar_lea.vmem [#allocation5], %s1367_s28  ;;  %s1126_s19 = sshll.u32 %s446_s16, 4  ;;  %s1127_s19 = int_to_ptr.vmem [resolvable:$true] %s1126_s19 }
 0x203   : > { %s1559_s1 = scalar_lea.vmem %s1127_s19, 64  ;;  %p1566_p11 = scmp.lt.s32.totalorder %s1127_s19, %s1564_s3 }
 0x204   : > { %v590_v48 = vadd.f32 %v589_v47, %v582_v46  ;;  %p1560_p6 = scmp.ne.s32.totalorder %s1127_s19, %s1559_s1  ;;  %p1567_p12 = scmp.lt.s32.totalorder %s1565_s4, %s1559_s1 }
 0x206   : > { %v598_v50 = vadd.f32 %v597_v49, %v590_v48  ;;  %p1561_p9 = pnand %p1560_p6, %p1886_p5  ;;  %p1568_p13 = por %p1567_p12, %p1566_p11 }
 0x208   : > { %682 = vrot.lane.b32.xlu1 %v598_v50, %s1773_s18  ;;  %1425 = vmatmul.mubr.msk.f32.vlgmr.msra.gmra.mxu1 %vm471_vm3, %v598_v50  ;;  %s2221_s18 = sand.u32 1, %s1867_s25   ;;  %p1562_p10 = pneg %p1561_p9 }
 0x209   : > { %1433 = vmatpush3.msk.msra.mxu1 %vm475_vm2, %v1919_v0  ;;  %1434 = vmatprep.mubr.msk.f32.mxu1 %vm1769_vm1, %v1768_v2  ;;  %s1999_s28 = scalar_lea.sflag [#allocation10], %s2221_s18 }
 0x20a   : > { %p1569_p0 = pnand %p1568_p13, %p1562_p10 }
 0x20c   : > { %838 = vrot.lane.b32.xlu1 %v598_v50, %s1774_s0  ;;  %1435 = vmatmul.mubr.msk.f32.vlgmr.msra.gmra.mxu1 %vm471_vm3, %v949_v51 }
 0x27a   : > { %v683_v53 = vpop.permute.xlu1 %682 }
 0x27b   : > { %1420 = vmatmul.mubr.msk.f32.vlgmr.msra.gmra.mxu0 %vm471_vm3, %v683_v53 }
 0x27c   : > { %1428 = vmatpush3.msk.msra.mxu0 %vm475_vm2, %v837_v54  ;;  %1429 = vmatprep.mubr.msk.f32.mxu0 %vm1769_vm1, %v1768_v2 }
 0x27e   : > { %v839_v55 = vpop.permute.xlu1 %838 }
 0x27f   : > { %1430 = vmatmul.mubr.msk.f32.vlgmr.msra.gmra.mxu0 %vm471_vm3, %v839_v55 }
 0x28c   : > { %v671_v56 = vpop.f32.mrf.mxu1 }
 0x28d   : > { %918 = vperm.xlu1 %1527, %v671_v56  }
 0x28e   : > { %v1416_v57 = vpop.f32.mrf.mxu1 }
 0x291   : > { %953 = vperm.xlu1 %1527, %v950_v58  }
 0x2c8   : > { %v829_v59 = vpop.f32.mrf.mxu1 }
 0x2ca   : > { %v1426_v60 = vpop.f32.mrf.mxu1 }
 0x2cc   : > { %v1025_v61 = vpop.f32.mrf.mxu1 }
 0x2ce   : > { %v1436_v62 = vpop.f32.mrf.mxu1 }
 0x308   : > { %v919_v63 = vpop.permute.xlu1 %918 }
 0x30c   : > { %v954_v0 = vpop.permute.xlu1 %953 }
 0x30d   : > { %v1026_v1 = vadd.f32 %v1025_v61, %v954_v0 }
 0x30f   : > { %v1029_v2 = vpack.c.bf16 %v1026_v1, %v1026_v1  ;;  %v1041_v14 = vmul.f32 %v1026_v1, %v1026_v1  ;;  %v1031_v15 = vsel %vm924_vm7, %v1026_v1, 0.0 }
 0x311   : > { %1030 = vst.msk [vmem:[%s446_s16] sm:$0xf] %vm464_vm0, %v1029_v2  ;;  %v1042_v16 = vsel %vm924_vm7, %v1041_v14, 0.0 }
 0x33b   : > { %v754_v3 = vpop.f32.mrf.mxu0 }
 0x33c   : > { %v830_v5 = vadd.f32 %v829_v59, %v754_v3 }
 0x33d   : > { %v1421_v4 = vpop.f32.mrf.mxu0 }
 0x33f   : > { %v911_v6 = vpop.f32.mrf.mxu0 }
 0x340   : > { %v915_v7 = vadd.f32 %v911_v6, %v830_v5 }
 0x341   : > { %v1431_v8 = vpop.f32.mrf.mxu0 }
 0x342   : > { %v921_v9 = vadd.f32 %v919_v63, %v915_v7 }
 0x344   : > { %v922_v10 = vpack.c.bf16 %v921_v9, %v921_v9  ;;  %v925_v11 = vsel %vm924_vm7, %v921_v9, 0.0  ;;  %v938_v12 = vmul.f32 %v921_v9, %v921_v9 }
 0x345   : > { %926 = vadd.xlane.f32.xlu1 %v925_v11 }
 0x346   : > { %v939_v13 = vsel %vm924_vm7, %v938_v12, 0.0  ;;  %923 = vst.msk [vmem:[%s1986_s29] sm:$0xf] %vm464_vm0, %v922_v10 }
 0x347   : > { %940 = vadd.xlane.f32.xlu0 %v939_v13 }
 0x349   : > { %1032 = vadd.xlane.f32.xlu1 %v1031_v15 }
 0x34b   : > { %1043 = vadd.xlane.f32.xlu0 %v1042_v16 }
 0x34c   : > { %1572 = shalt.err (!%p1569_p0)
}
 0x34d   : > { %s1573_s15 = scalar_lea.hbm %s1124_s17, 64  ;;  %s1577_s18 = scalar_lea.hbm %s2246_s10, 128 }
 0x34e   : > { %p1574_p1 = scmp.ne.s32.totalorder %s1124_s17, %s1573_s15  ;;  %p1578_p4 = scmp.lt.s32.totalorder %s1124_s17, %s2246_s10 }
 0x34f   : > { %p1579_p7 = scmp.lt.s32.totalorder %s1577_s18, %s1573_s15 }
 0x350   : > { %p1575_p2 = pnand %p1574_p1, %p1886_p5 }
 0x351   : > { %p1580_p8 = por %p1579_p7, %p1578_p4 }
 0x352   : > { %p1576_p3 = pneg %p1575_p2 }
 0x354   : > { %p1581_p6 = pnand %p1580_p8, %p1576_p3 }
 0x356   : > { %1584 = shalt.err (!%p1581_p6)
}
 0x357   : > { %1452 = dma.vmem_to_hbm [thread:$0]  (%p1886_p5), %s1127_s19, 64, %s1124_s17, %s1999_s28  }
 0x358   : > { %s2247_s1 = sshll.u32 %s1867_s25, 6  ;;  %s2248_s7 = sld [smem:[#allocation27_spill]] }
 0x359   : > { %s1087_s16 = sshll.u32 %s1986_s29, 4  ;;  %s1053_s5 = scalar_lea.sflag [#allocation4], %s1982_s20  ;;  %s1088_s16 = int_to_ptr.vmem [resolvable:$true] %s1087_s16 }
 0x35a   : > { %s1585_s18 = scalar_lea.vmem %s1088_s16, 64  ;;  %s1776_s26 = smov [#allocation5]  }
 0x35b   : > { %p1586_p9 = scmp.ne.s32.totalorder %s1088_s16, %s1585_s18  ;;  %s1589_s15 = sshll.u32 %s1776_s26, 4  ;;  %s1590_s15 = int_to_ptr.vmem [resolvable:$false] %s1589_s15 }
 0x35c   : > { %s1591_s0 = scalar_lea.vmem %s1590_s15, 128  ;;  %p1592_p12 = scmp.lt.s32.totalorder %s1088_s16, %s1590_s15 }
 0x35d   : > { %p1587_p10 = pnand %p1586_p9, %p1886_p5  ;;  %p1593_p13 = scmp.lt.s32.totalorder %s1591_s0, %s1585_s18 }
 0x35e   : > { %s1085_s4 = scalar_lea.hbm %s2248_s7, %s2247_s1 }
 0x35f   : > { %p1588_p11 = pneg %p1587_p10  ;;  %p1594_p0 = por %p1593_p13, %p1592_p12 }
 0x361   : > { %p1595_p1 = pnand %p1594_p0, %p1588_p11 }
 0x363   : > { %1598 = shalt.err (!%p1595_p1)
}
 0x364   : > { %s1599_s17 = scalar_lea.hbm %s1085_s4, 64  ;;  %s1603_s1 = scalar_lea.hbm %s2248_s7, 128 }
 0x365   : > { %p1600_p2 = scmp.ne.s32.totalorder %s1085_s4, %s1599_s17  ;;  %p1604_p7 = scmp.lt.s32.totalorder %s1085_s4, %s2248_s7 }
 0x366   : > { %p1605_p8 = scmp.lt.s32.totalorder %s1603_s1, %s1599_s17 }
 0x367   : > { %p1601_p3 = pnand %p1600_p2, %p1886_p5 }
 0x368   : > { %p1606_p6 = por %p1605_p8, %p1604_p7 }
 0x369   : > { %p1602_p4 = pneg %p1601_p3 }
 0x36b   : > { %p1607_p9 = pnand %p1606_p6, %p1602_p4 }
 0x36d   : > { %1610 = shalt.err (!%p1607_p9)
}
 0x36e   : > { %1449 = dma.vmem_to_hbm [thread:$0]  (%p1886_p5), %s1088_s16, 64, %s1085_s4, %s1053_s5   ;;  %v929_v17 = vlaneseq  ;;  %vm936_vm8 = vcmask 57344  }
 0x36f   : > { %s2036_s18 = sshll.u32 %s1867_s25, 4  ;;  %s433_s26 = scalar_lea.vmem [#allocation6], %s1982_s20 }
 0x370   : > { %v930_v18 = vand.u32 127, %v929_v17  ;;  %v932_v19 = vshrl.u32 %v929_v17, 7  ;;  %s1100_s15 = sshll.u32 %s433_s26, 4  ;;  %s2223_s0 = scalar_lea.vmem [#allocation8], %s1982_s20  ;;  %s2049_s15 = int_to_ptr.vmem [resolvable:$true] %s1100_s15 }
 0x371   : > { %s1113_s17 = sshll.u32 %s2223_s0, 4  ;;  %s2046_s5 = scalar_lea.hbm %s2215_s8, %s2036_s18  ;;  %s2057_s17 = int_to_ptr.vmem [resolvable:$true] %s1113_s17 }
 0x372   : > { %v2033_v20 = vsub.s32 %v930_v18, %v932_v19  ;;  %s2055_s1 = scalar_lea.hbm %s2216_s9, %s2036_s18  ;;  %s2224_s2 = scalar_lea.vmem [#allocation11], %s1982_s20 }
 0x373   : > { %s2062_s3 = sshll.u32 %s2224_s2, 4  ;;  %s2070_s29 = scalar_lea.hbm %s2218_s11, %s2036_s18  ;;  %s2107_s3 = int_to_ptr.vmem [resolvable:$true] %s2062_s3 }
 0x374   : > { %s2225_s19 = scalar_lea.vmem [#allocation12], %s1982_s20  ;;  %s2249_s6 = sand.u32 1, %s1867_s25  }
 0x375   : > { %s2075_s0 = sshll.u32 %s2225_s19, 4  ;;  %s2079_s7 = scalar_lea.sflag [#allocation7], %s2249_s6  ;;  %s2141_s0 = int_to_ptr.vmem [resolvable:$true] %s2075_s0 }
 0x376   : > { %s1611_s2 = scalar_lea.vmem %s2049_s15, 16  ;;  %s1777_s10 = smov [#allocation6]  }
 0x377   : > { %p1612_p10 = scmp.ne.s32.totalorder %s2049_s15, %s1611_s2 }
 0x379   : > { %p1613_p11 = pnand %p1612_p10, %p1886_p5 }
 0x37b   : > { %p1614_p12 = pneg %p1613_p11 }
 0x3ce   : > { %v927_v21 = vpop.xlane.xlu1 %926 }
 0x3cf   : > { %v934_v22 = vrot.slane %v927_v21, %v2033_v20 }
 0x3d0   : > { %v941_v23 = vpop.xlane.xlu0 %940 }
 0x3d1   : > { %v946_v24 = vrot.slane %v941_v23, %v2033_v20  ;;  %937 = vst.msk [vmem:[%s433_s26] sm:$0x1] %vm936_vm8, %v934_v22  ;;  %s1615_s26 = sshll.u32 %s1777_s10, 4  ;;  %s1616_s26 = int_to_ptr.vmem [resolvable:$false] %s1615_s26 }
 0x3d2   : > { %v1033_v25 = vpop.xlane.xlu1 %1032  ;;  %s1617_s30 = scalar_lea.vmem %s1616_s26, 32  ;;  %p1618_p13 = scmp.lt.s32.totalorder %s2049_s15, %s1616_s26 }
 0x3d3   : > { %p1619_p0 = scmp.lt.s32.totalorder %s1617_s30, %s1611_s2 }
 0x3d5   : > { %p1620_p1 = por %p1619_p0, %p1618_p13 }
 0x3d7   : > { %p1621_p2 = pnand %p1620_p1, %p1614_p12 }
 0x3d9   : > { %1624 = shalt.err (!%p1621_p2)
}
 0x3da   : > { %s1625_s6 = scalar_lea.hbm %s2046_s5, 16  ;;  %s1629_s10 = scalar_lea.hbm %s2215_s8, 32 }
 0x3db   : > { %p1626_p3 = scmp.ne.s32.totalorder %s2046_s5, %s1625_s6  ;;  %p1630_p8 = scmp.lt.s32.totalorder %s2046_s5, %s2215_s8 }
 0x3dc   : > { %p1631_p6 = scmp.lt.s32.totalorder %s1629_s10, %s1625_s6 }
 0x3dd   : > { %p1627_p4 = pnand %p1626_p3, %p1886_p5 }
 0x3de   : > { %p1632_p9 = por %p1631_p6, %p1630_p8 }
 0x3df   : > { %p1628_p7 = pneg %p1627_p4 }
 0x3e1   : > { %p1633_p10 = pnand %p1632_p9, %p1628_p7 }
 0x3e3   : > { %1636 = shalt.err (!%p1633_p10)
}
 0x3e4   : > { %1450 = dma.vmem_to_hbm [thread:$0]  (%p1886_p5), %s2049_s15, 16, %s2046_s5, %s2079_s7   ;;  %v1038_v26 = vrot.slane %v1033_v25, %v2033_v20  ;;  %v1044_v27 = vpop.xlane.xlu0 %1043 }
 0x3e5   : > { %s2250_s30 = scalar_lea.vmem [#allocation8], %s1982_s20  ;;  %s1637_s2 = scalar_lea.vmem %s2057_s17, 16 }
 0x3e6   : > { %948 = vst.msk [vmem:[%s2250_s30] sm:$0x1] %vm936_vm8, %v946_v24  ;;  %p1638_p11 = scmp.ne.s32.totalorder %s2057_s17, %s1637_s2  ;;  %s1778_s19 = smov [#allocation8]  }
 0x3e7   : > { %s1641_s26 = sshll.u32 %s1778_s19, 4  ;;  %s1642_s26 = int_to_ptr.vmem [resolvable:$false] %s1641_s26 }
 0x3e8   : > { %p1639_p12 = pnand %p1638_p11, %p1886_p5  ;;  %s1643_s6 = scalar_lea.vmem %s1642_s26, 32 }
 0x3e9   : > { %p1644_p0 = scmp.lt.s32.totalorder %s2057_s17, %s1642_s26  ;;  %p1645_p1 = scmp.lt.s32.totalorder %s1643_s6, %s1637_s2 }
 0x3ea   : > { %p1640_p13 = pneg %p1639_p12 }
 0x3eb   : > { %p1646_p2 = por %p1645_p1, %p1644_p0 }
 0x3ed   : > { %p1647_p3 = pnand %p1646_p2, %p1640_p13 }
 0x3ef   : > { %1650 = shalt.err (!%p1647_p3)
}
 0x3f0   : > { %s1651_s15 = scalar_lea.hbm %s2055_s1, 16  ;;  %s1655_s4 = scalar_lea.hbm %s2216_s9, 32 }
 0x3f1   : > { %p1652_p4 = scmp.ne.s32.totalorder %s2055_s1, %s1651_s15  ;;  %p1656_p6 = scmp.lt.s32.totalorder %s2055_s1, %s2216_s9 }
 0x3f2   : > { %p1657_p9 = scmp.lt.s32.totalorder %s1655_s4, %s1651_s15 }
 0x3f3   : > { %p1653_p7 = pnand %p1652_p4, %p1886_p5 }
 0x3f4   : > { %p1658_p10 = por %p1657_p9, %p1656_p6 }
 0x3f5   : > { %p1654_p8 = pneg %p1653_p7 }
 0x3f7   : > { %p1659_p11 = pnand %p1658_p10, %p1654_p8 }
 0x3f9   : > { %1662 = shalt.err (!%p1659_p11)
}
 0x3fa   : > { %1451 = dma.vmem_to_hbm [thread:$0]  (%p1886_p5), %s2057_s17, 16, %s2055_s1, %s2079_s7   ;;  %v1049_v28 = vrot.slane %v1044_v27, %v2033_v20 }
 0x3fb   : > { %s2251_s30 = scalar_lea.vmem [#allocation11], %s1982_s20  ;;  %s2138_s26 = scalar_lea.hbm %s2219_s12, %s2036_s18 }
 0x3fc   : > { %1040 = vst.msk [vmem:[%s2251_s30] sm:$0x1] %vm936_vm8, %v1038_v26  ;;  %s1663_s6 = scalar_lea.vmem %s2107_s3, 16  ;;  %s1779_s15 = smov [#allocation11]  }
 0x3fd   : > { %p1664_p12 = scmp.ne.s32.totalorder %s2107_s3, %s1663_s6  ;;  %s1667_s5 = sshll.u32 %s1779_s15, 4  ;;  %s1668_s5 = int_to_ptr.vmem [resolvable:$false] %s1667_s5 }
 0x3fe   : > { %s1669_s7 = scalar_lea.vmem %s1668_s5, 32  ;;  %p1670_p1 = scmp.lt.s32.totalorder %s2107_s3, %s1668_s5 }
 0x3ff   : > { %p1665_p13 = pnand %p1664_p12, %p1886_p5  ;;  %p1671_p2 = scmp.lt.s32.totalorder %s1669_s7, %s1663_s6 }
 0x401   : > { %p1666_p0 = pneg %p1665_p13  ;;  %p1672_p3 = por %p1671_p2, %p1670_p1 }
 0x403   : > { %p1673_p4 = pnand %p1672_p3, %p1666_p0 }
 0x405   : > { %1676 = shalt.err (!%p1673_p4)
}
 0x406   : > { %s1677_s18 = scalar_lea.hbm %s2070_s29, 16  ;;  %s1681_s25 = scalar_lea.hbm %s2218_s11, 32 }
 0x407   : > { %p1678_p7 = scmp.ne.s32.totalorder %s2070_s29, %s1677_s18  ;;  %p1682_p9 = scmp.lt.s32.totalorder %s2070_s29, %s2218_s11 }
 0x408   : > { %p1683_p10 = scmp.lt.s32.totalorder %s1681_s25, %s1677_s18 }
 0x409   : > { %p1679_p8 = pnand %p1678_p7, %p1886_p5 }
 0x40a   : > { %p1684_p11 = por %p1683_p10, %p1682_p9 }
 0x40b   : > { %p1680_p6 = pneg %p1679_p8 }
 0x40d   : > { %p1685_p12 = pnand %p1684_p11, %p1680_p6 }
 0x40f   : > { %1688 = shalt.err (!%p1685_p12)
}
 0x410   : > { %1453 = dma.vmem_to_hbm [thread:$0]  (%p1886_p5), %s2107_s3, 16, %s2070_s29, %s1999_s28  }
 0x411   : > { %s2252_s16 = scalar_lea.vmem [#allocation12], %s1982_s20  ;;  %s1075_s30 = scalar_lea.sflag [#allocation13], %s1982_s20 }
 0x412   : > { %1051 = vst.msk [vmem:[%s2252_s16] sm:$0x1] %vm936_vm8, %v1049_v28  ;;  %s1689_s2 = scalar_lea.vmem %s2141_s0, 16  ;;  %s1780_s19 = smov [#allocation12]  }
 0x413   : > { %p1690_p13 = scmp.ne.s32.totalorder %s2141_s0, %s1689_s2  ;;  %s1693_s6 = sshll.u32 %s1780_s19, 4  ;;  %s1694_s6 = int_to_ptr.vmem [resolvable:$false] %s1693_s6 }
 0x414   : > { %s1695_s15 = scalar_lea.vmem %s1694_s6, 32  ;;  %p1696_p2 = scmp.lt.s32.totalorder %s2141_s0, %s1694_s6 }
 0x415   : > { %p1691_p0 = pnand %p1690_p13, %p1886_p5  ;;  %p1697_p3 = scmp.lt.s32.totalorder %s1695_s15, %s1689_s2 }
 0x417   : > { %p1692_p1 = pneg %p1691_p0  ;;  %p1698_p4 = por %p1697_p3, %p1696_p2 }
 0x419   : > { %p1699_p7 = pnand %p1698_p4, %p1692_p1 }
 0x41b   : > { %1702 = shalt.err (!%p1699_p7)
}
 0x41c   : > { %s1703_s28 = scalar_lea.hbm %s2138_s26, 16  ;;  %s1707_s29 = scalar_lea.hbm %s2219_s12, 32 }
 0x41d   : > { %p1704_p8 = scmp.ne.s32.totalorder %s2138_s26, %s1703_s28  ;;  %p1708_p10 = scmp.lt.s32.totalorder %s2138_s26, %s2219_s12 }
 0x41e   : > { %p1709_p11 = scmp.lt.s32.totalorder %s1707_s29, %s1703_s28 }
 0x41f   : > { %p1705_p6 = pnand %p1704_p8, %p1886_p5 }
 0x420   : > { %p1710_p12 = por %p1709_p11, %p1708_p10 }
 0x421   : > { %p1706_p9 = pneg %p1705_p6 }
 0x423   : > { %p1711_p13 = pnand %p1710_p12, %p1706_p9 }
 0x425   : > { %1714 = shalt.err (!%p1711_p13)
}
 0x426   : > { %1454 = dma.vmem_to_hbm [thread:$0]  (%p1886_p5), %s2141_s0, 16, %s2138_s26, %s1075_s30  }
 0x427 PF: > { %p1486_p0 = scmp.ge.s32.totalorder %s1765_s24, 2  ;;  %s1164_s18 = sand.u32 1, %s1753_s21  }
 0x428   : > { %p2253_p1 = scmp.ne.s32.totalorder %s2237_s14, 0  ;;  %s1165_s17 = scalar_lea.sflag [#allocation4], %s1164_s18 }
 0x42a   : > { %p1466_p2 = pnand %p1486_p0, %p2253_p1 }
 0x42c   : > { %p1467_p3 = pneg %p1466_p2 }
 0x42e   : > { %1736 = dma.done.wait (%p1467_p3), %s1165_s17, 64  }
 0x42f   : > { %1738 = vsyncadd (%p1467_p3), %s1165_s17, 4294967232  ;;  %s2254_s1 = sadd.s32 4294967294, %s1765_s24  }
 0x430   : > { %s1173_s25 = sand.u32 1, %s2254_s1  }
 0x431   : > { %s1174_s4 = scalar_lea.sflag [#allocation7], %s1173_s25 }
 0x432   : > { %1740 = dma.done.wait (%p1467_p3), %s1174_s4, 32  }
 0x433   : > { %1742 = vsyncadd (%p1467_p3), %s1174_s4, 4294967264  ;;  %s1190_s13 = scalar_lea.sflag [#allocation10], %s1173_s25 }
 0x434   : > { %1744 = dma.done.wait (%p1467_p3), %s1190_s13, 80  }
 0x435   : > { %1746 = vsyncadd (%p1467_p3), %s1190_s13, 4294967216  ;;  %s1207_s0 = scalar_lea.sflag [#allocation13], %s1164_s18 }
 0x436   : > { %1748 = dma.done.wait (%p1467_p3), %s1207_s0, 16  }
 0x437   : > { %1750 = vsyncadd (%p1467_p3), %s1207_s0, 4294967280  ;;  %s2255_s14 = sld [smem:[#allocation19_spill]]  ;;  %p33_p5 = scmp.ge.s32.totalorder %s1871_s27, 4  }
 0x438   : > { %s2256_s21 = smov %s1757_s22  ;;  %s2257_s22 = smov %s1761_s23 }
 0x439   : > { %s2259_s24 = smov %s1871_s27  ;;  %35 = sbr.rel (!%p33_p5) target bundleno = 20 (0x14), region = 172 }
 0x43d   : > { %s2258_s23 = smov %s2255_s14 }
 0x43e   :  { %1211 = vsyncpa [#allocation3], 1 }
 0x43f   :  { %1213 = vsyncpa [#allocation3 + $0x1], 1 }
 0x440   :  { %1214 = vsyncpa [#allocation4], 1 }
 0x441   :  { %1216 = vsyncpa [#allocation4 + $0x1], 1 }
 0x442   :  { %1217 = vsyncpa [#allocation7], 1 }
 0x443   :  { %1219 = vsyncpa [#allocation7 + $0x1], 1 }
 0x444   :  { %1220 = vsyncpa [#allocation10], 1 }
 0x445   :  { %1222 = vsyncpa [#allocation10 + $0x1], 1 }
 0x446   :  { %1223 = vsyncpa [#allocation13], 1 }
 0x447   :  { %1225 = vsyncpa [#allocation13 + $0x1], 1 }

</bundles_post_ra>
